<compile_context>
chip_gen: v6e
topology: v6e:2x2x1
jax: 0.10.0
libtpu: 0.0.40
codegen_flags: <defaults>
</compile_context>

<pallas_src>
import functools
import math

import jax
import jax.numpy as jnp
from jax import lax
from jax.experimental import pallas as pl
from jax.experimental.pallas import tpu as pltpu


# ----------------------------------------------------------------------------
# Hardware-aware sizing helpers
# ----------------------------------------------------------------------------
_DEFAULT_VMEM = 64 * 1024 * 1024  # conservative fallback (v7x per-TC VMEM)


def _vmem_capacity_bytes():
    """Per-core VMEM capacity; conservative fallback if the query fails."""
    try:
        cap = getattr(pltpu.get_tpu_info(), "vmem_capacity_bytes", None)
        if cap:
            return int(cap)
    except Exception:
        pass
    return _DEFAULT_VMEM


def _round_up(x, m):
    return ((x + m - 1) // m) * m


def _pick_tile(n, cap, aligns=(128, 16, 8)):
    """Largest tile <= cap that divides n, preferring lane/sublane alignment."""
    if n <= cap:
        return n
    for a in aligns:
        t = (cap // a) * a
        while t >= a:
            if n % t == 0:
                return t
            t -= a
    # TODO(synk): pad the sequence instead of falling back to n for pathological
    # sequence lengths with no aligned divisor.
    return n


# ----------------------------------------------------------------------------
# Kernel 1: fused Q/K/V projection GEMM over B*S rows (K/V hoisted out of the
# attention grid; three separate dots to avoid in-lane-tile slicing).
# ----------------------------------------------------------------------------
def _qkv_proj_kernel(x_ref, wq_ref, wk_ref, wv_ref, q_ref, k_ref, v_ref):
    """x_ref: (tm, Dp) bf16; w*_ref: (Dp, Dp) bf16 (W^T, scale folded into Wq);
    q/k/v_ref: (tm, Dp) bf16 outputs."""
    xb = x_ref[...]
    q_ref[...] = jnp.dot(xb, wq_ref[...],
                         preferred_element_type=jnp.float32).astype(q_ref.dtype)
    k_ref[...] = jnp.dot(xb, wk_ref[...],
                         preferred_element_type=jnp.float32).astype(k_ref.dtype)
    v_ref[...] = jnp.dot(xb, wv_ref[...],
                         preferred_element_type=jnp.float32).astype(v_ref.dtype)


# ----------------------------------------------------------------------------
# Kernel 2: flash attention (online softmax) over pre-projected q, k, v.
# ----------------------------------------------------------------------------
def _flash_attention_kernel(q_ref, k_ref, v_ref, o_ref, m_sc, l_sc, acc_sc):
    """One grid step = one (batch, q-tile, kv-tile) triple.
      q_ref : (tq, Dp) bf16  pre-scaled query tile
      k_ref : (tk, Dp) bf16
      v_ref : (tk, Dp) bf16
      o_ref : (tq, Dp) f32   output tile (resident across the kv axis)
    Scratch (persists across the kv axis): m_sc (tq,1), l_sc (tq,1),
    acc_sc (tq,Dp), all f32.
    """
    ki = pl.program_id(2)

    @pl.when(ki == 0)
    def _init():
        m_sc[...] = jnp.full_like(m_sc, -jnp.inf)
        l_sc[...] = jnp.zeros_like(l_sc)
        acc_sc[...] = jnp.zeros_like(acc_sc)

    # Scores: contract the last (feature) dims directly — no k.T / XLU transpose.
    s = lax.dot_general(q_ref[...], k_ref[...],
                        dimension_numbers=(((1,), (1,)), ((), ())),
                        preferred_element_type=jnp.float32)        # (tq, tk) f32

    # Online softmax update; all elementwise math stays f32 (v5e-friendly).
    m_prev = m_sc[...]
    m_new = jnp.maximum(m_prev, jnp.max(s, axis=-1, keepdims=True))
    alpha = jnp.exp(m_prev - m_new)
    p = jnp.exp(s - m_new)
    l_sc[...] = alpha * l_sc[...] + jnp.sum(p, axis=-1, keepdims=True)
    acc_sc[...] = alpha * acc_sc[...] + jnp.dot(
        p.astype(jnp.bfloat16), v_ref[...], preferred_element_type=jnp.float32)
    m_sc[...] = m_new

    @pl.when(ki == pl.num_programs(2) - 1)
    def _finalize():
        inv_l = pl.reciprocal(l_sc[...], approx=True)   # EUP slot, nearly free
        o_ref[...] = (acc_sc[...] * inv_l).astype(o_ref.dtype)


# ----------------------------------------------------------------------------
# Wrapper
# ----------------------------------------------------------------------------
def self_attention_pallas(x, w_q, w_k, w_v, *, tq=None, tk=None, tm=None):
    """x: (B, S, D) f32.  w_*: (D, D) nn.Linear weights (out, in): y = x @ w.T."""
    B, S, D = x.shape
    orig_dtype = x.dtype
    scale = 1.0 / math.sqrt(float(D))
    Dp = _round_up(D, 128)          # lane-pad feature dim -> dense MXU/stores
    M = B * S

    # Generation-aware VMEM budget (leave headroom) and tile caps.
    vmem_cap = _vmem_capacity_bytes()
    vmem_limit = int(vmem_cap * 0.75)
    seq_cap = 512 if vmem_cap >= 100 * 1024 * 1024 else 256

    if tq is None:
        tq = _pick_tile(S, seq_cap)
    if tk is None:
        tk = _pick_tile(S, seq_cap)
    if tm is None:
        tm = _pick_tile(M, seq_cap)

    # Weights (out, in) -> W^T, zero-padded to (Dp, Dp), bf16.  The padding is
    # exact (padded rows/cols are zero), and 1/sqrt(D) is folded into W_q.
    def _prep_w(w, s=1.0):
        wt = jnp.asarray(w, jnp.float32).T * s
        return jnp.pad(wt, ((0, Dp - D), (0, Dp - D))).astype(jnp.bfloat16)

    wq_t = _prep_w(w_q, scale)
    wk_t = _prep_w(w_k)
    wv_t = _prep_w(w_v)

    # x -> bf16 once in the wrapper (halves HBM/VMEM bytes), lane-padded,
    # flattened to (B*S, Dp) rows for the projection GEMM.
    x2d = jnp.pad(x.astype(jnp.bfloat16),
                  ((0, 0), (0, 0), (0, Dp - D))).reshape(M, Dp)

    row_spec = pl.BlockSpec((tm, Dp), lambda i: (i, 0))
    # Resident weights: constant index_map -> single-buffer (double-buffering
    # them is pure VMEM waste, important on v7x at large D).
    w_spec = lambda: pl.BlockSpec((Dp, Dp), lambda i: (0, 0),
                                  pipeline_mode=pl.Buffered(1))

    q2d, k2d, v2d = pl.pallas_call(
        _qkv_proj_kernel,
        out_shape=(jax.ShapeDtypeStruct((M, Dp), jnp.bfloat16),) * 3,
        grid_spec=pltpu.PrefetchScalarGridSpec(
            num_scalar_prefetch=0,
            grid=(M // tm,),
            in_specs=[row_spec, w_spec(), w_spec(), w_spec()],
            out_specs=[row_spec, row_spec, row_spec],
        ),
        compiler_params=pltpu.CompilerParams(
            dimension_semantics=("parallel",),
            vmem_limit_bytes=vmem_limit,
        ),
    )(x2d, wq_t, wk_t, wv_t)

    q3 = q2d.reshape(B, S, Dp)
    k3 = k2d.reshape(B, S, Dp)
    v3 = v2d.reshape(B, S, Dp)

    # TODO(synk): sweep pl.Buffered(3) on the kv-side specs if the inner-step
    # DMA is exposed for small Dp on v6e/v7x.
    out_p = pl.pallas_call(
        _flash_attention_kernel,
        out_shape=jax.ShapeDtypeStruct((B, S, Dp), jnp.float32),
        grid_spec=pltpu.PrefetchScalarGridSpec(
            num_scalar_prefetch=0,
            grid=(B, S // tq, S // tk),        # kv (reduction) axis innermost
            in_specs=[
                pl.BlockSpec((None, tq, Dp), lambda b, qi, ki: (b, qi, 0)),
                pl.BlockSpec((None, tk, Dp), lambda b, qi, ki: (b, ki, 0)),
                pl.BlockSpec((None, tk, Dp), lambda b, qi, ki: (b, ki, 0)),
            ],
            out_specs=pl.BlockSpec((None, tq, Dp), lambda b, qi, ki: (b, qi, 0)),
            scratch_shapes=[
                pltpu.VMEM((tq, 1), jnp.float32),    # running row max
                pltpu.VMEM((tq, 1), jnp.float32),    # running softmax denom
                pltpu.VMEM((tq, Dp), jnp.float32),   # output accumulator
            ],
        ),
        compiler_params=pltpu.CompilerParams(
            dimension_semantics=("parallel", "parallel", "arbitrary"),
            vmem_limit_bytes=vmem_limit,
        ),
    )(q3, k3, v3)

    return out_p[..., :D].astype(orig_dtype)


def self_attention_ref(x, w_q, w_k, w_v):
    """Pure-JAX f32 reference matching the PyTorch forward exactly."""
    D = x.shape[-1]
    q = x @ w_q.T
    k = x @ w_k.T
    v = x @ w_v.T
    scores = (q @ jnp.swapaxes(k, -2, -1)) / math.sqrt(float(D))
    weights = jax.nn.softmax(scores, axis=-1)
    return weights @ v


if __name__ == "__main__":
    B, S, D = 2, 8, 32
    key = jax.random.PRNGKey(0)
    kx, kq, kk, kv = jax.random.split(key, 4)

    x = jax.random.normal(kx, (B, S, D), dtype=jnp.float32)

    # Mimic nn.Linear's uniform(-1/sqrt(D), 1/sqrt(D)); weight shape (out, in).
    bound = 1.0 / math.sqrt(D)
    w_q = jax.random.uniform(kq, (D, D), jnp.float32, -bound, bound)
    w_k = jax.random.uniform(kk, (D, D), jnp.float32, -bound, bound)
    w_v = jax.random.uniform(kv, (D, D), jnp.float32, -bound, bound)

    out = jax.block_until_ready(self_attention_pallas(x, w_q, w_k, w_v))
    ref = self_attention_ref(x, w_q, w_k, w_v)

    assert out.shape == (B, S, D)
    # bf16 MXU inputs + approx reciprocal -> loosened tolerance (f32 accumulate).
    assert jnp.allclose(out, ref, atol=5e-2, rtol=5e-2), "mismatch vs reference"

    print("KERNEL_OK")
</pallas_src>

<mosaic_0001>
module attributes {stable_mosaic.version = 11 : i64} {
  func.func @_qkv_proj_kernel(%arg0: i32, %arg1: memref<16x128xbf16, #tpu.memory_space<vmem>>, %arg2: memref<128x128xbf16, #tpu.memory_space<vmem>>, %arg3: memref<128x128xbf16, #tpu.memory_space<vmem>>, %arg4: memref<128x128xbf16, #tpu.memory_space<vmem>>, %arg5: memref<16x128xbf16, #tpu.memory_space<vmem>>, %arg6: memref<16x128xbf16, #tpu.memory_space<vmem>>, %arg7: memref<16x128xbf16, #tpu.memory_space<vmem>>) attributes {dimension_semantics = [#tpu.dimension_semantics<parallel>], iteration_bounds = array<i64: 1>, scalar_prefetch = 0 : i64, scratch_operands = 0 : i64, tpu.core_type = #tpu.core_type<tc>, window_params = [{transform_indices = @transform_0, window_bounds = array<i64: 16, 128>}, {pipeline_mode = #tpu.pipeline_mode<synchronous>, transform_indices = @transform_1, window_bounds = array<i64: 128, 128>}, {pipeline_mode = #tpu.pipeline_mode<synchronous>, transform_indices = @transform_2, window_bounds = array<i64: 128, 128>}, {pipeline_mode = #tpu.pipeline_mode<synchronous>, transform_indices = @transform_3, window_bounds = array<i64: 128, 128>}, {transform_indices = @transform_4, window_bounds = array<i64: 16, 128>}, {transform_indices = @transform_5, window_bounds = array<i64: 16, 128>}, {transform_indices = @transform_6, window_bounds = array<i64: 16, 128>}]} {
    %c0 = arith.constant 0 : index
    %c0_0 = arith.constant 0 : index
    %0 = vector.load %arg1[%c0, %c0_0] : memref<16x128xbf16, #tpu.memory_space<vmem>>, vector<16x128xbf16>
    %c0_1 = arith.constant 0 : index
    %c0_2 = arith.constant 0 : index
    %1 = vector.load %arg2[%c0_1, %c0_2] : memref<128x128xbf16, #tpu.memory_space<vmem>>, vector<128x128xbf16>
    %cst = arith.constant dense<0.000000e+00> : vector<16x128xf32>
    %2 = tpu.matmul %0, %1, %cst {dimension_numbers = #tpu.dot_dimension_numbers<[1], [0], [0], [1], [0, 0, 1, 1], [], []>} : vector<16x128xbf16>, vector<128x128xbf16>, vector<16x128xf32> -> vector<16x128xf32>
    %3 = arith.truncf %2 : vector<16x128xf32> to vector<16x128xbf16>
    %c0_3 = arith.constant 0 : index
    %c0_4 = arith.constant 0 : index
    %4 = vector.load %arg5[%c0_3, %c0_4] : memref<16x128xbf16, #tpu.memory_space<vmem>>, vector<16x128xbf16>
    tpu.vector_store %arg5[%c0_3, %c0_4], %3 {strides = array<i32>} : memref<16x128xbf16, #tpu.memory_space<vmem>>, vector<16x128xbf16>,
    %c0_5 = arith.constant 0 : index
    %c0_6 = arith.constant 0 : index
    %5 = vector.load %arg3[%c0_5, %c0_6] : memref<128x128xbf16, #tpu.memory_space<vmem>>, vector<128x128xbf16>
    %cst_7 = arith.constant dense<0.000000e+00> : vector<16x128xf32>
    %6 = tpu.matmul %0, %5, %cst_7 {dimension_numbers = #tpu.dot_dimension_numbers<[1], [0], [0], [1], [0, 0, 1, 1], [], []>} : vector<16x128xbf16>, vector<128x128xbf16>, vector<16x128xf32> -> vector<16x128xf32>
    %7 = arith.truncf %6 : vector<16x128xf32> to vector<16x128xbf16>
    %c0_8 = arith.constant 0 : index
    %c0_9 = arith.constant 0 : index
    %8 = vector.load %arg6[%c0_8, %c0_9] : memref<16x128xbf16, #tpu.memory_space<vmem>>, vector<16x128xbf16>
    tpu.vector_store %arg6[%c0_8, %c0_9], %7 {strides = array<i32>} : memref<16x128xbf16, #tpu.memory_space<vmem>>, vector<16x128xbf16>,
    %c0_10 = arith.constant 0 : index
    %c0_11 = arith.constant 0 : index
    %9 = vector.load %arg4[%c0_10, %c0_11] : memref<128x128xbf16, #tpu.memory_space<vmem>>, vector<128x128xbf16>
    %cst_12 = arith.constant dense<0.000000e+00> : vector<16x128xf32>
    %10 = tpu.matmul %0, %9, %cst_12 {dimension_numbers = #tpu.dot_dimension_numbers<[1], [0], [0], [1], [0, 0, 1, 1], [], []>} : vector<16x128xbf16>, vector<128x128xbf16>, vector<16x128xf32> -> vector<16x128xf32>
    %11 = arith.truncf %10 : vector<16x128xf32> to vector<16x128xbf16>
    %c0_13 = arith.constant 0 : index
    %c0_14 = arith.constant 0 : index
    %12 = vector.load %arg7[%c0_13, %c0_14] : memref<16x128xbf16, #tpu.memory_space<vmem>>, vector<16x128xbf16>
    tpu.vector_store %arg7[%c0_13, %c0_14], %11 {strides = array<i32>} : memref<16x128xbf16, #tpu.memory_space<vmem>>, vector<16x128xbf16>,
    return
  }
  func.func @transform_0(%arg0: i32) -> (i32, i32) {
    %c0_i32 = arith.constant 0 : i32
    %c0_i32_0 = arith.constant 0 : i32
    return %arg0, %c0_i32 : i32, i32
  }
  func.func @transform_1(%arg0: i32) -> (i32, i32) {
    %c0_i32 = arith.constant 0 : i32
    %c0_i32_0 = arith.constant 0 : i32
    %c0_i32_1 = arith.constant 0 : i32
    return %c0_i32, %c0_i32_0 : i32, i32
  }
  func.func @transform_2(%arg0: i32) -> (i32, i32) {
    %c0_i32 = arith.constant 0 : i32
    %c0_i32_0 = arith.constant 0 : i32
    %c0_i32_1 = arith.constant 0 : i32
    return %c0_i32, %c0_i32_0 : i32, i32
  }
  func.func @transform_3(%arg0: i32) -> (i32, i32) {
    %c0_i32 = arith.constant 0 : i32
    %c0_i32_0 = arith.constant 0 : i32
    %c0_i32_1 = arith.constant 0 : i32
    return %c0_i32, %c0_i32_0 : i32, i32
  }
  func.func @transform_4(%arg0: i32) -> (i32, i32) {
    %c0_i32 = arith.constant 0 : i32
    %c0_i32_0 = arith.constant 0 : i32
    return %arg0, %c0_i32 : i32, i32
  }
  func.func @transform_5(%arg0: i32) -> (i32, i32) {
    %c0_i32 = arith.constant 0 : i32
    %c0_i32_0 = arith.constant 0 : i32
    return %arg0, %c0_i32 : i32, i32
  }
  func.func @transform_6(%arg0: i32) -> (i32, i32) {
    %c0_i32 = arith.constant 0 : i32
    %c0_i32_0 = arith.constant 0 : i32
    return %arg0, %c0_i32 : i32, i32
  }
}

</mosaic_0001>

<bundles_post_ra>
// kernel: tpu_custom_call.1
= control target key start
LH: loop header
LB: loop body
LE: loop exit
PB: predicated region body
PF: predicated region fallthrough
CT: control target
= control target key end

     0   :  { %12 = vsyncpa [#allocation3], 0  ;;  %s924_s0 = inlined_call_operand.hbm [shape: bf16[16,128], index: 0, kind: input, shape index: {}]   ;;  %s925_s1 = inlined_call_operand.hbm [shape: bf16[128,128], index: 1, kind: input, shape index: {}]   ;;  %s926_s2 = inlined_call_operand.hbm [shape: bf16[128,128], index: 2, kind: input, shape index: {}]   ;;  %s927_s3 = inlined_call_operand.hbm [shape: bf16[128,128], index: 3, kind: input, shape index: {}]   ;;  %s928_s4 = inlined_call_operand.hbm [shape: bf16[16,128], index: 4, kind: output, shape index: {0}]   ;;  %s929_s5 = inlined_call_operand.hbm [shape: bf16[16,128], index: 5, kind: output, shape index: {1}]   ;;  %s930_s6 = inlined_call_operand.hbm [shape: bf16[16,128], index: 6, kind: output, shape index: {2}]  }
   0x1   :  { %13 = vsyncpa [#allocation6], 0 }
   0x2   :  { %14 = vsyncpa [#allocation9], 0 }
   0x3   :  { %15 = vsyncpa [#allocation4], 0 }
   0x4   :  { %16 = vsyncpa [#allocation12], 0  ;;  %s806_s21 = smov [#allocation5]   ;;  %s807_s23 = smov [#allocation2]  }
   0x5   :  { %s34_s22 = sshll.u32 %s806_s21, 4  ;;  %s22_s24 = sshll.u32 %s807_s23, 4  ;;  %s35_s22 = int_to_ptr.vmem [resolvable:$true] %s34_s22  ;;  %s23_s24 = int_to_ptr.vmem [resolvable:$true] %s22_s24 }
   0x6   :  { %s664_s25 = scalar_lea.vmem %s35_s22, 1024  ;;  %p669_p1 = scmp.lt.s32.totalorder %s35_s22, %s35_s22 }
   0x7   :  { %p665_p0 = scmp.ne.s32.totalorder %s35_s22, %s664_s25  ;;  %p670_p2 = scmp.lt.s32.totalorder %s664_s25, %s664_s25 }
   0x9   :  { %p671_p3 = por %p670_p2, %p669_p1 }
   0xb   :  { %p672_p4 = pnand %p671_p3, %p665_p0 }
   0xd   :  { %675 = shalt.err (!%p672_p4)
}
   0xe   :  { %s808_s26 = smov 64   ;;  %s809_s27 = smov 4  }
   0xf   :  { %40 = dma.hbm_to_vmem [thread:$0]  %s925_s1, 1024, %s35_s22, [#allocation6], %s808_s26, %s808_s26, %s809_s27  }
  0x10   :  { %s684_s30 = scalar_lea.vmem %s23_s24, 128  ;;  %p689_p6 = scmp.lt.s32.totalorder %s23_s24, %s23_s24 }
  0x11   :  { %p685_p5 = scmp.ne.s32.totalorder %s23_s24, %s684_s30  ;;  %p690_p7 = scmp.lt.s32.totalorder %s684_s30, %s684_s30 }
  0x13   :  { %p691_p8 = por %p690_p7, %p689_p6 }
  0x15   :  { %p692_p9 = pnand %p691_p8, %p685_p5 }
  0x17   :  { %695 = shalt.err (!%p692_p9)
}
  0x18   :  { %28 = dma.hbm_to_vmem [thread:$0]  %s924_s0, 128, %s23_s24, [#allocation3], %s808_s26, %s808_s26, %s809_s27  }
  0x19   :  { %s810_s9 = smov [#allocation7]   ;;  %s811_s11 = smov [#allocation8]  }
  0x1a   :  { %s46_s10 = sshll.u32 %s810_s9, 4  ;;  %s58_s12 = sshll.u32 %s811_s11, 4  ;;  %s47_s10 = int_to_ptr.vmem [resolvable:$true] %s46_s10  ;;  %s59_s12 = int_to_ptr.vmem [resolvable:$true] %s58_s12 }
  0x1b   :  { %s704_s1 = scalar_lea.vmem %s47_s10, 1024  ;;  %p709_p11 = scmp.lt.s32.totalorder %s47_s10, %s47_s10 }
  0x1c   :  { %p705_p10 = scmp.ne.s32.totalorder %s47_s10, %s704_s1  ;;  %p710_p12 = scmp.lt.s32.totalorder %s704_s1, %s704_s1 }
  0x1e   :  { %p711_p13 = por %p710_p12, %p709_p11 }
  0x20   :  { %p712_p0 = pnand %p711_p13, %p705_p10 }
  0x22   :  { %715 = shalt.err (!%p712_p0)
}
  0x23   :  { %52 = dma.hbm_to_vmem [thread:$0]  %s926_s2, 1024, %s47_s10, [#allocation6], %s808_s26, %s808_s26, %s809_s27  }
  0x24   :  { %s724_s0 = scalar_lea.vmem %s59_s12, 1024  ;;  %p729_p2 = scmp.lt.s32.totalorder %s59_s12, %s59_s12 }
  0x25   :  { %p725_p1 = scmp.ne.s32.totalorder %s59_s12, %s724_s0  ;;  %p730_p3 = scmp.lt.s32.totalorder %s724_s0, %s724_s0 }
  0x27   :  { %p731_p4 = por %p730_p3, %p729_p2 }
  0x29   :  { %p732_p5 = pnand %p731_p4, %p725_p1 }
  0x2b   :  { %735 = shalt.err (!%p732_p5)
}
  0x2c   :  { %64 = dma.hbm_to_vmem [thread:$0]  %s927_s3, 1024, %s59_s12, [#allocation9], %s808_s26, %s808_s26, %s809_s27  }
  0x2d   :  { %796 = dma.done.wait [#allocation3], 128  }
  0x2e   :  { %797 = vsyncadd [#allocation3], 4294967168 }
  0x2f   :  { %798 = dma.done.wait [#allocation6], 2048  }
  0x30   :  { %799 = vsyncadd [#allocation6], 4294965248 }
  0x31   :  { %800 = dma.done.wait [#allocation9], 1024  }
  0x32   :  { %801 = vsyncadd [#allocation9], 4294966272  ;;  %v812_v0 = vmov 0.0   ;;  %vm813_vm0 = vmmov 0   ;;  %v631_v1 = vld [vmem:[#allocation5 + $0x38] sm:$0xff]   ;;  %v632_v2 = vld [vmem:[#allocation5 + $0x30] sm:$0xff]  }
  0x33   :  { %560 = vmatprep.subr.bf16.mxu0 %v812_v0  ;;  %580 = vmatprep.subr.bf16.mxu1 %v812_v0  ;;  %v633_v3 = vld [vmem:[#allocation5 + $0x28] sm:$0xff]   ;;  %v638_v4 = vld [vmem:[#allocation7 + $0x38] sm:$0xff]   ;;  %v640_v5 = vld [vmem:[#allocation7 + $0x30] sm:$0xff]   ;;  %s814_s2 = smov [#allocation10]  }
  0x34   :  { %576 = vmatprep.mubr.msk.bf16.mxu0 %vm813_vm0, %v812_v0  ;;  %596 = vmatprep.mubr.msk.bf16.mxu1 %vm813_vm0, %v812_v0  ;;  %v634_v6 = vld [vmem:[#allocation5 + $0x20] sm:$0xff]   ;;  %v643_v7 = vld [vmem:[#allocation7 + $0x28] sm:$0xff]   ;;  %v635_v8 = vld [vmem:[#allocation5 + $0x18] sm:$0xff]   ;;  %s436_s3 = sshll.u32 %s814_s2, 4  ;;  %s437_s3 = int_to_ptr.vmem [resolvable:$true] %s436_s3 }
  0x35   :  { %561 = vmatpush3.bf16.msra.mxu0 %v631_v1  ;;  %581 = vmatpush3.bf16.msra.mxu1 %v638_v4  ;;  %v645_v9 = vld [vmem:[#allocation7 + $0x20] sm:$0xff]   ;;  %v636_v10 = vld [vmem:[#allocation5 + $0x10] sm:$0xff]   ;;  %v647_v11 = vld [vmem:[#allocation7 + $0x18] sm:$0xff]   ;;  %s736_s17 = scalar_lea.vmem %s437_s3, 128  ;;  %p741_p7 = scmp.lt.s32.totalorder %s437_s3, %s437_s3 }
  0x36   :  { %562 = vmatprep.subr.bf16.mxu0 %v812_v0  ;;  %582 = vmatprep.subr.bf16.mxu1 %v812_v0  ;;  %v637_v12 = vld [vmem:[#allocation5 + $0x8] sm:$0xff]   ;;  %v649_v13 = vld [vmem:[#allocation7 + $0x10] sm:$0xff]   ;;  %v639_v14 = vld [vmem:[#allocation5] sm:$0xff]   ;;  %p737_p6 = scmp.ne.s32.totalorder %s437_s3, %s736_s17  ;;  %p742_p8 = scmp.lt.s32.totalorder %s736_s17, %s736_s17 }
  0x37   :  { %v641_v15 = vld [vmem:[#allocation2] sm:$0xff]   ;;  %v651_v16 = vld [vmem:[#allocation7 + $0x8] sm:$0xff]   ;;  %v653_v18 = vld [vmem:[#allocation7] sm:$0xff]  }
  0x38   :  { %v642_v17 = vld [vmem:[#allocation8 + $0x38] sm:$0xff]   ;;  %v644_v19 = vld [vmem:[#allocation8 + $0x30] sm:$0xff]   ;;  %v646_v20 = vld [vmem:[#allocation8 + $0x28] sm:$0xff]   ;;  %p743_p9 = por %p742_p8, %p741_p7 }
  0x39   :  { %563 = vmatpush3.bf16.msra.mxu0 %v632_v2  ;;  %583 = vmatpush3.bf16.msra.mxu1 %v640_v5  ;;  %v648_v21 = vld [vmem:[#allocation8 + $0x20] sm:$0xff]   ;;  %v650_v22 = vld [vmem:[#allocation8 + $0x18] sm:$0xff]   ;;  %v652_v23 = vld [vmem:[#allocation8 + $0x10] sm:$0xff]  }
  0x3a   :  { %564 = vmatprep.subr.bf16.mxu0 %v812_v0  ;;  %584 = vmatprep.subr.bf16.mxu1 %v812_v0  ;;  %v654_v24 = vld [vmem:[#allocation8 + $0x8] sm:$0xff]   ;;  %v655_v25 = vld [vmem:[#allocation8] sm:$0xff]   ;;  %p744_p10 = pnand %p743_p9, %p737_p6 }
  0x3d   :  { %565 = vmatpush3.bf16.msra.mxu0 %v633_v3  ;;  %585 = vmatpush3.bf16.msra.mxu1 %v643_v7 }
  0x3e   :  { %566 = vmatprep.subr.bf16.mxu0 %v812_v0  ;;  %586 = vmatprep.subr.bf16.mxu1 %v812_v0 }
  0x41   :  { %567 = vmatpush3.bf16.msra.mxu0 %v634_v6  ;;  %587 = vmatpush3.bf16.msra.mxu1 %v645_v9 }
  0x42   :  { %568 = vmatprep.subr.bf16.mxu0 %v812_v0  ;;  %588 = vmatprep.subr.bf16.mxu1 %v812_v0 }
  0x45   :  { %569 = vmatpush3.bf16.msra.mxu0 %v635_v8  ;;  %589 = vmatpush3.bf16.msra.mxu1 %v647_v11 }
  0x46   :  { %570 = vmatprep.subr.bf16.mxu0 %v812_v0  ;;  %590 = vmatprep.subr.bf16.mxu1 %v812_v0 }
  0x49   :  { %571 = vmatpush3.bf16.msra.mxu0 %v636_v10  ;;  %591 = vmatpush3.bf16.msra.mxu1 %v649_v13 }
  0x4a   :  { %572 = vmatprep.subr.bf16.mxu0 %v812_v0  ;;  %592 = vmatprep.subr.bf16.mxu1 %v812_v0 }
  0x4d   :  { %573 = vmatpush3.bf16.msra.mxu0 %v637_v12  ;;  %593 = vmatpush3.bf16.msra.mxu1 %v651_v16 }
  0x4e   :  { %574 = vmatprep.subr.bf16.mxu0 %v812_v0  ;;  %594 = vmatprep.subr.bf16.mxu1 %v812_v0 }
  0x51   :  { %575 = vmatpush3.bf16.msra.mxu0 %v639_v14  ;;  %595 = vmatpush3.bf16.msra.mxu1 %v653_v18 }
  0x52   :  { %600 = vmatprep.subr.bf16.mxu0 %v812_v0 }
  0x54   :  { %577 = vmatmul.mubr.bf16.vlgmr.msra.gmra.mxu0 %v641_v15  ;;  %597 = vmatmul.mubr.bf16.vlgmr.msra.gmra.mxu1 %v641_v15 }
  0x55   :  { %601 = vmatpush3.bf16.msra.mxu0 %v642_v17  ;;  %616 = vmatprep.mubr.msk.bf16.mxu0 %vm813_vm0, %v812_v0 }
  0x56   :  { %602 = vmatprep.subr.bf16.mxu0 %v812_v0 }
  0x59   :  { %603 = vmatpush3.bf16.msra.mxu0 %v644_v19 }
  0x5a   :  { %604 = vmatprep.subr.bf16.mxu0 %v812_v0 }
  0x5d   :  { %605 = vmatpush3.bf16.msra.mxu0 %v646_v20 }
  0x5e   :  { %606 = vmatprep.subr.bf16.mxu0 %v812_v0 }
  0x61   :  { %607 = vmatpush3.bf16.msra.mxu0 %v648_v21 }
  0x62   :  { %608 = vmatprep.subr.bf16.mxu0 %v812_v0 }
  0x65   :  { %609 = vmatpush3.bf16.msra.mxu0 %v650_v22 }
  0x66   :  { %610 = vmatprep.subr.bf16.mxu0 %v812_v0 }
  0x69   :  { %611 = vmatpush3.bf16.msra.mxu0 %v652_v23 }
  0x6a   :  { %612 = vmatprep.subr.bf16.mxu0 %v812_v0 }
  0x6d   :  { %613 = vmatpush3.bf16.msra.mxu0 %v654_v24 }
  0x6e   :  { %614 = vmatprep.subr.bf16.mxu0 %v812_v0 }
  0x71   :  { %615 = vmatpush3.bf16.msra.mxu0 %v655_v25 }
  0x74   :  { %617 = vmatmul.mubr.bf16.vlgmr.msra.gmra.mxu0 %v641_v15 }
 0x114   :  { %v184_v26 = vpop.f32.mrf.mxu0  ;;  %v299_v31 = vpop.f32.mrf.mxu1 }
 0x116   :  { %v578_v27 = vpop.f32.mrf.mxu0 }
 0x118   :  { %v187_v28 = vpop.f32.mrf.mxu0 }
 0x119   :  { %v521_v29 = vpack.c.bf16 %v187_v28, %v184_v26 }
 0x11a   :  { %v579_v30 = vpop.f32.mrf.mxu0 }
 0x11b   :  { %522 = vst [vmem:[#allocation10] sm:$0xff] %v521_v29  }
 0x11c   :  { %747 = shalt.err (!%p744_p10)
}
 0x11d   :  { %442 = dma.vmem_to_hbm [thread:$0]  %s437_s3, 128, %s928_s4, [#allocation4], %s808_s26, %s808_s26, %s809_s27   ;;  %v598_v32 = vpop.f32.mrf.mxu1 }
 0x11e   :  { %s815_s20 = smov [#allocation11]  }
 0x11f   :  { %s448_s21 = sshll.u32 %s815_s20, 4  ;;  %v302_v33 = vpop.f32.mrf.mxu1  ;;  %s449_s21 = int_to_ptr.vmem [resolvable:$true] %s448_s21 }
 0x120   :  { %v526_v34 = vpack.c.bf16 %v302_v33, %v299_v31  ;;  %s756_s22 = scalar_lea.vmem %s449_s21, 128  ;;  %p761_p12 = scmp.lt.s32.totalorder %s449_s21, %s449_s21 }
 0x121   :  { %v599_v35 = vpop.f32.mrf.mxu1  ;;  %p757_p11 = scmp.ne.s32.totalorder %s449_s21, %s756_s22  ;;  %p762_p13 = scmp.lt.s32.totalorder %s756_s22, %s756_s22 }
 0x122   :  { %527 = vst [vmem:[#allocation11] sm:$0xff] %v526_v34  }
 0x123   :  { %p763_p0 = por %p762_p13, %p761_p12 }
 0x125   :  { %p764_p1 = pnand %p763_p0, %p757_p11 }
 0x127   :  { %767 = shalt.err (!%p764_p1)
}
 0x128   :  { %454 = dma.vmem_to_hbm [thread:$0]  %s449_s21, 128, %s929_s5, [#allocation12], %s808_s26, %s808_s26, %s809_s27  }
 0x129   :  { %s816_s24 = smov [#allocation13]  }
 0x12a   :  { %s460_s25 = sshll.u32 %s816_s24, 4  ;;  %s461_s25 = int_to_ptr.vmem [resolvable:$true] %s460_s25 }
 0x12b   :  { %s776_s28 = scalar_lea.vmem %s461_s25, 128  ;;  %p781_p3 = scmp.lt.s32.totalorder %s461_s25, %s461_s25 }
 0x12c   :  { %p777_p2 = scmp.ne.s32.totalorder %s461_s25, %s776_s28  ;;  %p782_p4 = scmp.lt.s32.totalorder %s776_s28, %s776_s28 }
 0x12e   :  { %p783_p5 = por %p782_p4, %p781_p3 }
 0x130   :  { %p784_p6 = pnand %p783_p5, %p777_p2 }
 0x134   :  { %v414_v36 = vpop.f32.mrf.mxu0 }
 0x136   :  { %v618_v37 = vpop.f32.mrf.mxu0 }
 0x138   :  { %v417_v38 = vpop.f32.mrf.mxu0 }
 0x139   :  { %v531_v39 = vpack.c.bf16 %v417_v38, %v414_v36 }
 0x13a   :  { %v619_v40 = vpop.f32.mrf.mxu0 }
 0x13b   :  { %532 = vst [vmem:[#allocation13] sm:$0xff] %v531_v39  }
 0x13c   :  { %787 = shalt.err (!%p784_p6)
}
 0x13d   :  { %466 = dma.vmem_to_hbm [thread:$0]  %s461_s25, 128, %s930_s6, [#allocation12], %s808_s26, %s808_s26, %s809_s27  }
 0x13e   :  { %802 = dma.done.wait [#allocation4], 128  }
 0x13f   :  { %803 = vsyncadd [#allocation4], 4294967168 }
 0x140   :  { %804 = dma.done.wait [#allocation12], 256  }
 0x141   :  { %805 = vsyncadd [#allocation12], 4294967040 }
 0x142   :  { %476 = vsyncpa [#allocation3], 1 }
 0x143   :  { %477 = vsyncpa [#allocation6], 1 }
 0x144   :  { %478 = vsyncpa [#allocation9], 1 }
 0x145   :  { %479 = vsyncpa [#allocation4], 1 }
 0x146   :  { %480 = vsyncpa [#allocation12], 1 }

</bundles_post_ra>
